<compile_context>
chip_gen: v5e
topology: v5e:2x2
jax: 0.10.0
libtpu: 0.0.40
codegen_flags: <defaults>
</compile_context>

<pallas_src>
import functools

import jax
import jax.numpy as jnp
from jax.experimental import pallas as pl
from jax.experimental.pallas import tpu as pltpu

ACT_DTYPE = jnp.bfloat16

CSP_CFG = [  # (in_channels, out_channels, num_blocks)
    (3, 64, 1),
    (64, 128, 2),
    (128, 256, 8),
    (256, 512, 8),
    (512, 1024, 4),
]


def _tpu_vmem_limit():
    """Per-generation scoped-VMEM budget (128 MiB parts vs v7x's 64 MiB)."""
    try:
        cap = int(pltpu.get_tpu_info().vmem_capacity_bytes)
    except Exception:
        cap = 64 * 1024 * 1024          # conservative fallback (v7x-sized)
    return min(int(cap * 0.7), 96 * 1024 * 1024)


_VMEM_LIMIT = _tpu_vmem_limit()


def _leaky(x):
    return jnp.where(x > 0, x, 0.1 * x)


def _pick_tile_m(m, cap):
    """Largest divisor of m <= cap preferring 256/32/16/8 multiples (bf16 packing)."""
    cap = max(1, min(cap, m))
    for mult in (256, 32, 16, 8):
        best, d = 0, mult
        while d <= cap:
            if m % d == 0:
                best = d
            d += mult
        if best:
            return best
    if m <= 4096:                        # no aligned divisor; small m -> take it whole
        return m
    best = 1
    for d in range(1, cap + 1):
        if m % d == 0:
            best = d
    return best


def _divisors_desc(n):
    return [d for d in range(n, 0, -1) if n % d == 0]


# ----------------------------- Pallas kernels ------------------------------

def _stem_kernel(x_ref, w_ref, b_ref, o_ref, *, cout):
    # x: (TM, Cin) bf16 ; w: (Cin, 2*Cout) bf16 = [W_main_bnfolded || W_shortcut]
    # b: (1, 2*Cout) f32 = [bn_shift || 0] ; o: (TM, 2*Cout) bf16
    y = jnp.dot(x_ref[...], w_ref[...], preferred_element_type=jnp.float32)
    y = y + b_ref[...]
    lane = jax.lax.broadcasted_iota(jnp.int32, y.shape, 1)
    # LeakyReLU only on the main half; shortcut half is a plain 1x1 conv.
    o_ref[...] = jnp.where(lane < cout, _leaky(y), y).astype(o_ref.dtype)


def _conv3x3_kernel(x_ref, w_ref, b_ref, o_ref, *, resident):
    # resident : x_ref = (B, H+2, W, 3*Cin) full dx-folded padded activation
    # halo     : x_ref = (1, B, TH+2, W, 3*Cin) row-window with 2-row halo
    # w_ref    : (3, 3*Cin, TC) bf16 (dy-major, dx folded into K)
    # b_ref    : (1, TC) f32 ; o_ref: (B, TH, W, TC) bf16
    B, TH, W, TC = o_ref.shape
    K = x_ref.shape[-1]
    M = B * TH * W
    if resident:
        row0 = pl.multiple_of(pl.program_id(1) * TH, TH)
    acc = None
    for dy in range(3):
        if resident:
            tap = x_ref[:, pl.ds(row0 + dy, TH), :, :]       # H-axis slice only
        else:
            tap = x_ref[0, :, pl.ds(dy, TH), :, :]
        part = jnp.dot(tap.reshape(M, K), w_ref[dy],
                       preferred_element_type=jnp.float32)
        acc = part if acc is None else acc + part            # value accumulator
    y = _leaky(acc + b_ref[...])
    o_ref[...] = y.reshape(B, TH, W, TC).astype(o_ref.dtype)


def _merge_kernel(m_ref, s_ref, wm_ref, ws_ref, o_ref):
    # concat([main, shortcut], C) @ W  ==  main @ W[:C] + shortcut @ W[C:]
    o = (jnp.dot(m_ref[...], wm_ref[...], preferred_element_type=jnp.float32)
         + jnp.dot(s_ref[...], ws_ref[...], preferred_element_type=jnp.float32))
    o_ref[...] = o.astype(o_ref.dtype)


# ------------------------------- wrappers -----------------------------------

def conv1x1_stem(x, w, b, cout):
    """Fused stem: one matmul emitting [main(BN+LeakyReLU) || shortcut] lanes."""
    B, H, W, Cin = x.shape
    Cout2 = w.shape[1]                      # == 2 * cout
    if Cin % 8:                             # pad RGB=3 input channels with zeros
        pad_c = 8 - Cin % 8
        x = jnp.pad(x, ((0, 0), (0, 0), (0, 0), (0, pad_c)))
        w = jnp.pad(w, ((0, pad_c), (0, 0)))
        Cin += pad_c
    M = B * H * W
    x2 = x.reshape(M, Cin)
    w_bytes = 2 * Cin * Cout2 * 2
    per_row = 4 * Cin + 4 * Cout2           # dbl-buffered bf16 in + out per row
    tm_cap = max(8, min(4096, (max(0, _VMEM_LIMIT - w_bytes) // 2) // per_row))
    TM = _pick_tile_m(M, tm_cap)
    kern = functools.partial(_stem_kernel, cout=cout)
    out = pl.pallas_call(
        kern,
        grid=(M // TM,),
        in_specs=[
            pl.BlockSpec((TM, Cin), lambda i: (i, 0)),
            pl.BlockSpec((Cin, Cout2), lambda i: (0, 0)),
            pl.BlockSpec((1, Cout2), lambda i: (0, 0)),
        ],
        out_specs=pl.BlockSpec((TM, Cout2), lambda i: (i, 0)),
        out_shape=jax.ShapeDtypeStruct((M, Cout2), ACT_DTYPE),
        compiler_params=pltpu.CompilerParams(
            dimension_semantics=("parallel",),
            vmem_limit_bytes=_VMEM_LIMIT),
    )(x2, w, b)
    return out.reshape(B, H, W, Cout2)


def conv3x3_bn_lrelu(x, w, b, *, mode=None, tile_h=None):
    """nn.Conv2d(C, C, 3, 1, 1, bias=False) + BN (folded) + LeakyReLU(0.1).

    w is the dx-folded weight of shape (3, 3*Cin, Cout); b is (1, Cout) f32.
    """
    B, H, W, Cin = x.shape
    Cout = w.shape[-1]
    TC = min(Cout, 256)
    assert Cout % TC == 0
    K = 3 * Cin

    # Glue: zero-pad and pre-shift the 3 dx taps into the channel (lane) dim so
    # the kernel never slices the sublane (W) axis.
    xp = jnp.pad(x, ((0, 0), (1, 1), (1, 1), (0, 0)))
    xc = jnp.concatenate(
        [xp[:, :, 0:W, :], xp[:, :, 1:W + 1, :], xp[:, :, 2:W + 2, :]], axis=-1)

    resident_bytes = B * (H + 2) * W * K * 2          # bf16 dx-folded activation
    w_bytes = 2 * 3 * K * TC * 2                      # dbl-buffered weight tile

    def _step_bytes(th, halo):
        rows = B * th * W
        bts = w_bytes + 2 * rows * TC * 2 + rows * TC * 4   # out (dbl) + f32 acc
        if halo:
            bts += 2 * B * (th + 2) * W * K * 2             # dbl-buffered halo tile
        return bts

    target_rows = 2048 if _VMEM_LIMIT >= (64 << 20) else 1024
    if tile_h is None:
        tile_h = 1
        for d in _divisors_desc(H):
            if B * d * W <= target_rows and _step_bytes(d, halo=True) <= _VMEM_LIMIT:
                tile_h = d
                break
    TH = tile_h
    if mode is None:
        mode = ("resident"
                if 2 * resident_bytes + _step_bytes(TH, halo=False) <= _VMEM_LIMIT
                else "halo")

    grid = (Cout // TC, H // TH)           # row axis innermost -> weight tile
    w_spec = pl.BlockSpec((3, K, TC), lambda c, h: (0, 0, c))   # DMA'd once per c
    b_spec = pl.BlockSpec((1, TC), lambda c, h: (0, c))
    o_spec = pl.BlockSpec((B, TH, W, TC), lambda c, h: (0, h, 0, c))

    if mode == "resident":
        x_arr = xc
        x_spec = pl.BlockSpec((B, H + 2, W, K), lambda c, h: (0, 0, 0, 0))
    else:
        # Halo tiling: duplicate the 2 halo rows per TH-row window in glue so a
        # plain BlockSpec can stream (TH+2)-row tiles (needed on v7x / big maps).
        n_h = H // TH
        x_arr = jnp.stack([xc[:, h * TH:h * TH + TH + 2] for h in range(n_h)], axis=0)
        x_spec = pl.BlockSpec((1, B, TH + 2, W, K), lambda c, h: (h, 0, 0, 0, 0))

    kern = functools.partial(_conv3x3_kernel, resident=(mode == "resident"))
    return pl.pallas_call(
        kern,
        grid=grid,
        in_specs=[x_spec, w_spec, b_spec],
        out_specs=o_spec,
        out_shape=jax.ShapeDtypeStruct((B, H, W, Cout), ACT_DTYPE),
        compiler_params=pltpu.CompilerParams(
            dimension_semantics=("parallel", "parallel"),
            vmem_limit_bytes=_VMEM_LIMIT),
    )(x_arr, w, b)


def conv1x1_merge(main, stem_out, wm, ws):
    """Fused torch.cat([main, shortcut], C) followed by 1x1 concat_conv."""
    B, H, W, C = main.shape
    Cout = wm.shape[1]
    M = B * H * W
    m2 = main.reshape(M, C)
    if C % 128 == 0:
        # Read the shortcut half straight out of the stem's fused (M, 2C) output.
        s2 = stem_out.reshape(M, 2 * C)
        s_blk = 1
    else:
        # C=64 stage: block last-dim must equal full dim -> slice in glue (tiny).
        s2 = stem_out[..., C:].reshape(M, C)
        s_blk = 0
    w_bytes = 2 * (2 * C * Cout * 2)
    per_row = 4 * C + 4 * C + 4 * Cout
    tm_cap = max(8, min(4096, (max(0, _VMEM_LIMIT - w_bytes) // 2) // per_row))
    TM = _pick_tile_m(M, tm_cap)
    out = pl.pallas_call(
        _merge_kernel,
        grid=(M // TM,),
        in_specs=[
            pl.BlockSpec((TM, C), lambda i: (i, 0)),
            pl.BlockSpec((TM, C), lambda i, s=s_blk: (i, s)),
            pl.BlockSpec((C, Cout), lambda i: (0, 0)),
            pl.BlockSpec((C, Cout), lambda i: (0, 0)),
        ],
        out_specs=pl.BlockSpec((TM, Cout), lambda i: (i, 0)),
        out_shape=jax.ShapeDtypeStruct((M, Cout), ACT_DTYPE),
        compiler_params=pltpu.CompilerParams(
            dimension_semantics=("parallel",),
            vmem_limit_bytes=_VMEM_LIMIT),
    )(m2, s2, wm, ws)
    return out.reshape(B, H, W, Cout)


# --------------------------- parameter init ---------------------------------

def _conv_w(key, shape, fan_in):
    bound = 1.0 / jnp.sqrt(float(fan_in))
    return jax.random.uniform(key, shape, jnp.float32, -bound, bound)


def _bn_params(key, c):
    k1, k2, k3, k4 = jax.random.split(key, 4)
    gamma = jax.random.uniform(k1, (c,), jnp.float32, 0.8, 1.2)
    beta = jax.random.uniform(k2, (c,), jnp.float32, -0.1, 0.1)
    mean = jax.random.uniform(k3, (c,), jnp.float32, -0.1, 0.1)
    var = jax.random.uniform(k4, (c,), jnp.float32, 0.8, 1.2)
    return gamma, beta, mean, var


def _fold_bn(w, gamma, beta, mean, var, eps=1e-5):
    # conv (bias=False) followed by eval-mode BN -> scale folded into weights.
    scale = gamma / jnp.sqrt(var + eps)
    w_f = (w * scale).astype(ACT_DTYPE)                 # broadcast over Cout axis
    b_f = (beta - mean * scale).reshape(1, -1)          # f32 shift
    return w_f, b_f


def init_params(key):
    blocks = []
    for cin, cout, nblk in CSP_CFG:
        key, km, kbn, ks, kc = jax.random.split(key, 5)
        wm_f, bm = _fold_bn(_conv_w(km, (cin, cout), cin), *_bn_params(kbn, cout))
        ws = _conv_w(ks, (cin, cout), cin).astype(ACT_DTYPE)
        stem_w = jnp.concatenate([wm_f, ws], axis=1)                       # (cin, 2C)
        stem_b = jnp.concatenate([bm, jnp.zeros((1, cout), jnp.float32)], axis=1)
        conv3 = []
        for _ in range(nblk):
            key, kw, kb = jax.random.split(key, 3)
            w3 = _conv_w(kw, (3, 3, cout, cout), 9 * cout)
            w3_f, b3 = _fold_bn(w3, *_bn_params(kb, cout))
            conv3.append((w3_f.reshape(3, 3 * cout, cout), b3))            # dx->K fold
        wc = _conv_w(kc, (2 * cout, cout), 2 * cout)                       # concat_conv
        blocks.append(dict(
            stem_w=stem_w, stem_b=stem_b, conv3=conv3,
            merge_wm=wc[:cout].astype(ACT_DTYPE),        # rows for 'main'
            merge_ws=wc[cout:].astype(ACT_DTYPE),        # rows for 'shortcut'
        ))
    return blocks


# ------------------------------- forward ------------------------------------

def csp_block_forward(x, p):
    cout = p["stem_w"].shape[1] // 2
    stem = conv1x1_stem(x, p["stem_w"], p["stem_b"], cout)   # (B,H,W,2C) fused
    main = stem[..., :cout]
    # TODO(synk): fuse this conv3x3 chain (nblk up to 8) into a single
    # pallas_call with the activation resident in VMEM (ping-pong padded
    # buffers + per-block weight streaming) to cut the HBM round trips.
    for w3, b3 in p["conv3"]:
        main = conv3x3_bn_lrelu(main, w3, b3)
    return conv1x1_merge(main, stem, p["merge_wm"], p["merge_ws"])


def yolov4_backbone_forward(x, params):
    x = x.astype(ACT_DTYPE)
    outs = []
    for i, p in enumerate(params):
        x = csp_block_forward(x, p)
        if i >= 2:                       # out3, out4, out5
            outs.append(x)
    return tuple(outs)


# --------------------------- pure-JAX references -----------------------------

def _ref_stem(x, w, b, cout):
    y = jnp.einsum('bhwc,cd->bhwd', x.astype(jnp.float32), w.astype(jnp.float32))
    y = y + b.reshape(1, 1, 1, -1)
    return jnp.concatenate([_leaky(y[..., :cout]), y[..., cout:]], axis=-1)


def _ref_conv3x3(x, w_folded, b):
    B, H, W, C = x.shape
    xp = jnp.pad(x.astype(jnp.float32), ((0, 0), (1, 1), (1, 1), (0, 0)))
    wf = w_folded.astype(jnp.float32).reshape(3, 3, C, -1)
    acc = 0.0
    for dy in range(3):
        for dx in range(3):
            acc = acc + jnp.einsum('bhwc,cd->bhwd',
                                   xp[:, dy:dy + H, dx:dx + W, :], wf[dy, dx])
    return _leaky(acc + b.reshape(1, 1, 1, -1))


def _ref_merge(main, short, wm, ws):
    return (jnp.einsum('bhwc,cd->bhwd', main.astype(jnp.float32), wm.astype(jnp.float32))
            + jnp.einsum('bhwc,cd->bhwd', short.astype(jnp.float32), ws.astype(jnp.float32)))


def _close(a, b, tol=0.05):
    a = a.astype(jnp.float32)
    b = b.astype(jnp.float32)
    denom = float(jnp.maximum(jnp.max(jnp.abs(b)), 1e-3))
    return float(jnp.max(jnp.abs(a - b))) / denom < tol


# --------------------------------- main --------------------------------------

if __name__ == "__main__":
    B, H, W = 2, 16, 16
    key = jax.random.PRNGKey(0)
    kx, kp = jax.random.split(key)
    # NHWC input (PyTorch reference uses NCHW (B, 3, H, W)).
    x = jax.random.normal(kx, (B, H, W, 3), jnp.float32)
    params = init_params(kp)

    # ---- per-kernel numerical self-checks against pure-JAX f32 references ----
    p0 = params[0]
    c0 = p0["stem_w"].shape[1] // 2
    xb = x.astype(ACT_DTYPE)

    stem = conv1x1_stem(xb, p0["stem_w"], p0["stem_b"], c0)
    assert _close(stem, _ref_stem(xb, p0["stem_w"], p0["stem_b"], c0)), "stem mismatch"

    main0 = stem[..., :c0]
    w3, b3 = p0["conv3"][0]
    y_res = conv3x3_bn_lrelu(main0, w3, b3, mode="resident")
    y_halo = conv3x3_bn_lrelu(main0, w3, b3, mode="halo", tile_h=8)
    assert _close(y_res, _ref_conv3x3(main0, w3, b3)), "conv3x3 mismatch"
    assert _close(y_halo, y_res, tol=1e-2), "halo-tiled conv3x3 mismatch"

    mrg = conv1x1_merge(y_res, stem, p0["merge_wm"], p0["merge_ws"])
    assert _close(mrg, _ref_merge(y_res, stem[..., c0:],
                                  p0["merge_wm"], p0["merge_ws"])), "merge mismatch"

    # ------------------------------ full backbone -----------------------------
    fwd = jax.jit(yolov4_backbone_forward)
    out3, out4, out5 = fwd(x, params)
    jax.block_until_ready((out3, out4, out5))

    assert out3.shape == (B, H, W, 256), out3.shape
    assert out4.shape == (B, H, W, 512), out4.shape
    assert out5.shape == (B, H, W, 1024), out5.shape
    assert all(bool(jnp.all(jnp.isfinite(o.astype(jnp.float32))))
               for o in (out3, out4, out5))
    print("KERNEL_OK")
</pallas_src>

<mosaic_0001>
module attributes {stable_mosaic.version = 11 : i64} {
  func.func @_stem_kernel(%arg0: i32, %arg1: memref<512x8xbf16, #tpu.memory_space<vmem>>, %arg2: memref<8x128xbf16, #tpu.memory_space<vmem>>, %arg3: memref<1x128xf32, #tpu.memory_space<vmem>>, %arg4: memref<512x128xbf16, #tpu.memory_space<vmem>>) attributes {dimension_semantics = [#tpu.dimension_semantics<parallel>], iteration_bounds = array<i64: 1>, scalar_prefetch = 0 : i64, scratch_operands = 0 : i64, tpu.core_type = #tpu.core_type<tc>, window_params = [{transform_indices = @transform_0, window_bounds = array<i64: 512, 8>}, {pipeline_mode = #tpu.pipeline_mode<synchronous>, transform_indices = @transform_1, window_bounds = array<i64: 8, 128>}, {pipeline_mode = #tpu.pipeline_mode<synchronous>, transform_indices = @transform_2, window_bounds = array<i64: 1, 128>}, {transform_indices = @transform_3, window_bounds = array<i64: 512, 128>}]} {
    %c0 = arith.constant 0 : index
    %c0_0 = arith.constant 0 : index
    %0 = vector.load %arg1[%c0, %c0_0] : memref<512x8xbf16, #tpu.memory_space<vmem>>, vector<512x8xbf16>
    %c0_1 = arith.constant 0 : index
    %c0_2 = arith.constant 0 : index
    %1 = vector.load %arg2[%c0_1, %c0_2] : memref<8x128xbf16, #tpu.memory_space<vmem>>, vector<8x128xbf16>
    %cst = arith.constant dense<0.000000e+00> : vector<512x128xf32>
    %2 = tpu.matmul %0, %1, %cst {dimension_numbers = #tpu.dot_dimension_numbers<[1], [0], [0], [1], [0, 0, 1, 1], [], []>} : vector<512x8xbf16>, vector<8x128xbf16>, vector<512x128xf32> -> vector<512x128xf32>
    %c0_3 = arith.constant 0 : index
    %c0_4 = arith.constant 0 : index
    %3 = vector.load %arg3[%c0_3, %c0_4] : memref<1x128xf32, #tpu.memory_space<vmem>>, vector<1x128xf32>
    %4 = vector.broadcast %3 : vector<1x128xf32> to vector<512x128xf32>
    %5 = arith.addf %2, %4 : vector<512x128xf32>
    %6 = tpu.iota {dimensions = array<i32: 1>} : vector<512x128xi32>
    %c64_i32 = arith.constant 64 : i32
    %7 = vector.broadcast %c64_i32 : i32 to vector<512x128xi32>
    %8 = arith.cmpi slt, %6, %7 : vector<512x128xi32>
    %cst_5 = arith.constant 0.000000e+00 : f32
    %9 = vector.broadcast %cst_5 : f32 to vector<512x128xf32>
    %10 = arith.cmpf ogt, %5, %9 : vector<512x128xf32>
    %cst_6 = arith.constant 1.000000e-01 : f32
    %11 = vector.broadcast %cst_6 : f32 to vector<512x128xf32>
    %12 = arith.mulf %11, %5 : vector<512x128xf32>
    %13 = arith.select %10, %5, %12 : vector<512x128xi1>, vector<512x128xf32>
    %14 = arith.select %8, %13, %5 : vector<512x128xi1>, vector<512x128xf32>
    %15 = arith.truncf %14 : vector<512x128xf32> to vector<512x128xbf16>
    %c0_7 = arith.constant 0 : index
    %c0_8 = arith.constant 0 : index
    %16 = vector.load %arg4[%c0_7, %c0_8] : memref<512x128xbf16, #tpu.memory_space<vmem>>, vector<512x128xbf16>
    tpu.vector_store %arg4[%c0_7, %c0_8], %15 {strides = array<i32>} : memref<512x128xbf16, #tpu.memory_space<vmem>>, vector<512x128xbf16>,
    return
  }
  func.func @transform_0(%arg0: i32) -> (i32, i32) {
    %c0_i32 = arith.constant 0 : i32
    %c0_i32_0 = arith.constant 0 : i32
    return %arg0, %c0_i32 : i32, i32
  }
  func.func @transform_1(%arg0: i32) -> (i32, i32) {
    %c0_i32 = arith.constant 0 : i32
    %c0_i32_0 = arith.constant 0 : i32
    %c0_i32_1 = arith.constant 0 : i32
    return %c0_i32, %c0_i32_0 : i32, i32
  }
  func.func @transform_2(%arg0: i32) -> (i32, i32) {
    %c0_i32 = arith.constant 0 : i32
    %c0_i32_0 = arith.constant 0 : i32
    %c0_i32_1 = arith.constant 0 : i32
    return %c0_i32, %c0_i32_0 : i32, i32
  }
  func.func @transform_3(%arg0: i32) -> (i32, i32) {
    %c0_i32 = arith.constant 0 : i32
    %c0_i32_0 = arith.constant 0 : i32
    return %arg0, %c0_i32 : i32, i32
  }
}

</mosaic_0001>

<bundles_post_ra>
// kernel: tpu_custom_call.1
= control target key start
LH: loop header
LB: loop body
LE: loop exit
PB: predicated region body
PF: predicated region fallthrough
CT: control target
= control target key end

     0   :  { %vm342_vm0 = vcmask 1043456   ;;  %vm245_vm1 = vcmask 64512   ;;  %s1693_s0 = inlined_call_operand.vmem [shape: bf16[512,8], index: 0, kind: input, shape index: {}]   ;;  %s1694_s1 = inlined_call_operand.vmem [shape: bf16[8,128], index: 1, kind: input, shape index: {}]   ;;  %s1695_s2 = inlined_call_operand.vmem [shape: f32[1,128], index: 2, kind: input, shape index: {}]   ;;  %s1696_s3 = inlined_call_operand.hbm [shape: bf16[512,128], index: 3, kind: output, shape index: {}]  }
   0x1   :  { %v80_v0 = vld [vmem:[%s1694_s1] sm:$0xf] }
   0x2   :  { %v344_v1 = vsel %vm342_vm0, %v80_v0, 0  ;;  %v1080_v2 = vld [vmem:[%s1693_s0] sm:$0xff] }
   0x3   :  { %v1088_v3 = vld [vmem:[%s1693_s0 + $0x40] sm:$0xff]  ;;  %353 = vmatpush.bf16.msra.mxu0 %v344_v1  ;;  %1303 = vmatpush.bf16.msra.mxu1 %v344_v1 }
   0x4   :  { %v1096_v4 = vld [vmem:[%s1693_s0 + $0x80] sm:$0xff]  ;;  %1304 = vmatpush.bf16.msra.mxu2 %v344_v1  ;;  %1305 = vmatpush.bf16.msra.mxu3 %v344_v1 }
   0x5   :  { %v1104_v5 = vld [vmem:[%s1693_s0 + $0xc0] sm:$0xff] }
   0x6   :  { %8 = vsyncpa [#allocation3], 0  ;;  %1048 = vmatmul.msk.bf16.vlgmr.msra.gmra.mxu0 %vm245_vm1, %v1080_v2  ;;  %1056 = vmatmul.msk.bf16.vlgmr.msra.gmra.mxu1 %vm245_vm1, %v1088_v3  ;;  %v1081_v6 = vld [vmem:[%s1693_s0 + $0x8] sm:$0xff]  ;;  %v1082_v10 = vld [vmem:[%s1693_s0 + $0x10] sm:$0xff]  ;;  %v515_v36 = vlaneseq  ;;  %s908_s25 = sshll.u32 %s1696_s3, 4  ;;  %s1337_s3 = smov 64   ;;  %s909_s25 = int_to_ptr.hbm [resolvable:$true] %s908_s25 }
   0x7   :  { %1064 = vmatmul.msk.bf16.vlgmr.msra.gmra.mxu2 %vm245_vm1, %v1096_v4  ;;  %1072 = vmatmul.msk.bf16.vlgmr.msra.gmra.mxu3 %vm245_vm1, %v1104_v5  ;;  %v1089_v7 = vld [vmem:[%s1693_s0 + $0x48] sm:$0xff]  ;;  %v1090_v11 = vld [vmem:[%s1693_s0 + $0x50] sm:$0xff]  ;;  %v1083_v14 = vld [vmem:[%s1693_s0 + $0x18] sm:$0xff]  ;;  %s1338_s26 = smov 4  }
   0x8   :  { %v1097_v8 = vld [vmem:[%s1693_s0 + $0x88] sm:$0xff]  ;;  %v1098_v12 = vld [vmem:[%s1693_s0 + $0x90] sm:$0xff]  ;;  %v1091_v15 = vld [vmem:[%s1693_s0 + $0x58] sm:$0xff]  ;;  %v1497_v40 = vand.u32 127, %v515_v36 }
   0x9   :  { %v1105_v9 = vld [vmem:[%s1693_s0 + $0xc8] sm:$0xff]  ;;  %v1106_v13 = vld [vmem:[%s1693_s0 + $0xd0] sm:$0xff]  ;;  %v1099_v16 = vld [vmem:[%s1693_s0 + $0x98] sm:$0xff] }
   0xa   :  { %v1107_v17 = vld [vmem:[%s1693_s0 + $0xd8] sm:$0xff]  ;;  %v1084_v18 = vld [vmem:[%s1693_s0 + $0x20] sm:$0xff]  ;;  %v1085_v22 = vld [vmem:[%s1693_s0 + $0x28] sm:$0xff]  ;;  %vm517_vm4 = vcmp.lt.s32.totalorder %v1497_v40, 64 }
   0xb   :  { %v1092_v19 = vld [vmem:[%s1693_s0 + $0x60] sm:$0xff]  ;;  %v1093_v23 = vld [vmem:[%s1693_s0 + $0x68] sm:$0xff]  ;;  %v1086_v26 = vld [vmem:[%s1693_s0 + $0x30] sm:$0xff] }
   0xc   :  { %v1100_v20 = vld [vmem:[%s1693_s0 + $0xa0] sm:$0xff]  ;;  %v1101_v24 = vld [vmem:[%s1693_s0 + $0xa8] sm:$0xff]  ;;  %v1094_v27 = vld [vmem:[%s1693_s0 + $0x70] sm:$0xff] }
   0xd   :  { %v1108_v21 = vld [vmem:[%s1693_s0 + $0xe0] sm:$0xff]  ;;  %v1109_v25 = vld [vmem:[%s1693_s0 + $0xe8] sm:$0xff]  ;;  %v1102_v28 = vld [vmem:[%s1693_s0 + $0xb0] sm:$0xff] }
   0xe   :  { %v1110_v29 = vld [vmem:[%s1693_s0 + $0xf0] sm:$0xff]  ;;  %v1087_v30 = vld [vmem:[%s1693_s0 + $0x38] sm:$0xff]  ;;  %v1493_v34 = vld [vmem:[%s1695_s2] ss:$0 sm:$0xff] }
   0xf   :  { %v1095_v31 = vld [vmem:[%s1693_s0 + $0x78] sm:$0xff] }
  0x10   :  { %v1103_v32 = vld [vmem:[%s1693_s0 + $0xb8] sm:$0xff] }
  0x11   :  { %v1111_v33 = vld [vmem:[%s1693_s0 + $0xf8] sm:$0xff]  ;;  %s1336_s0 = smov [#allocation2]  }
  0x12   :  { %s906_s2 = sshll.u32 %s1336_s0, 4  ;;  %s907_s2 = int_to_ptr.vmem [resolvable:$true] %s906_s2 }
  0x16   :  { %1049 = vmatmul.msk.bf16.gmra.mxu0 %vm245_vm1, %v1081_v6  ;;  %1057 = vmatmul.msk.bf16.gmra.mxu1 %vm245_vm1, %v1089_v7 }
  0x17   :  { %1065 = vmatmul.msk.bf16.gmra.mxu2 %vm245_vm1, %v1097_v8  ;;  %1073 = vmatmul.msk.bf16.gmra.mxu3 %vm245_vm1, %v1105_v9 }
  0x26   :  { %1050 = vmatmul.msk.bf16.gmra.mxu0 %vm245_vm1, %v1082_v10  ;;  %1058 = vmatmul.msk.bf16.gmra.mxu1 %vm245_vm1, %v1090_v11 }
  0x27   :  { %1066 = vmatmul.msk.bf16.gmra.mxu2 %vm245_vm1, %v1098_v12  ;;  %1074 = vmatmul.msk.bf16.gmra.mxu3 %vm245_vm1, %v1106_v13 }
  0x36   :  { %1051 = vmatmul.msk.bf16.gmra.mxu0 %vm245_vm1, %v1083_v14  ;;  %1059 = vmatmul.msk.bf16.gmra.mxu1 %vm245_vm1, %v1091_v15 }
  0x37   :  { %1067 = vmatmul.msk.bf16.gmra.mxu2 %vm245_vm1, %v1099_v16  ;;  %1075 = vmatmul.msk.bf16.gmra.mxu3 %vm245_vm1, %v1107_v17 }
  0x46   :  { %1052 = vmatmul.msk.bf16.gmra.mxu0 %vm245_vm1, %v1084_v18  ;;  %1060 = vmatmul.msk.bf16.gmra.mxu1 %vm245_vm1, %v1092_v19 }
  0x47   :  { %1068 = vmatmul.msk.bf16.gmra.mxu2 %vm245_vm1, %v1100_v20  ;;  %1076 = vmatmul.msk.bf16.gmra.mxu3 %vm245_vm1, %v1108_v21 }
  0x56   :  { %1053 = vmatmul.msk.bf16.gmra.mxu0 %vm245_vm1, %v1085_v22  ;;  %1061 = vmatmul.msk.bf16.gmra.mxu1 %vm245_vm1, %v1093_v23 }
  0x57   :  { %1069 = vmatmul.msk.bf16.gmra.mxu2 %vm245_vm1, %v1101_v24  ;;  %1077 = vmatmul.msk.bf16.gmra.mxu3 %vm245_vm1, %v1109_v25 }
  0x66   :  { %1054 = vmatmul.msk.bf16.gmra.mxu0 %vm245_vm1, %v1086_v26  ;;  %1062 = vmatmul.msk.bf16.gmra.mxu1 %vm245_vm1, %v1094_v27 }
  0x67   :  { %1070 = vmatmul.msk.bf16.gmra.mxu2 %vm245_vm1, %v1102_v28  ;;  %1078 = vmatmul.msk.bf16.gmra.mxu3 %vm245_vm1, %v1110_v29 }
  0x76   :  { %1055 = vmatmul.msk.bf16.gmra.mxu0 %vm245_vm1, %v1087_v30  ;;  %1063 = vmatmul.msk.bf16.gmra.mxu1 %vm245_vm1, %v1095_v31 }
  0x77   :  { %1071 = vmatmul.msk.bf16.gmra.mxu2 %vm245_vm1, %v1103_v32  ;;  %1079 = vmatmul.msk.bf16.gmra.mxu3 %vm245_vm1, %v1111_v33 }
  0x83   :  { %v355_v35 = vpop.f32.mrf.mxu0  ;;  %v395_v37 = vpop.f32.mrf.mxu1 }
  0x84   :  { %v356_v38 = vadd.f32 %v1493_v34, %v355_v35  ;;  %v396_v39 = vadd.f32 %v1493_v34, %v395_v37 }
  0x86   :  { %v582_v41 = vmul.f32 0.1, %v356_v38  ;;  %v598_v42 = vmul.f32 0.1, %v396_v39  ;;  %vm518_vm2 = vcmp.gt.f32.partialorder %v356_v38, 0.0  ;;  %vm534_vm3 = vcmp.gt.f32.partialorder %v396_v39, 0.0 }
  0x88   :  { %v646_v45 = vsel %vm518_vm2, %v356_v38, %v582_v41  ;;  %v662_v46 = vsel %vm534_vm3, %v396_v39, %v598_v42 }
  0x89   :  { %v710_v55 = vsel %vm517_vm4, %v646_v45, %v356_v38  ;;  %v726_v56 = vsel %vm517_vm4, %v662_v46, %v396_v39 }
  0x8a   :  { %v435_v43 = vpop.f32.mrf.mxu2  ;;  %v475_v44 = vpop.f32.mrf.mxu3 }
  0x8b   :  { %v357_v47 = vpop.f32.mrf.mxu0  ;;  %v397_v48 = vpop.f32.mrf.mxu1  ;;  %v436_v49 = vadd.f32 %v1493_v34, %v435_v43  ;;  %v476_v50 = vadd.f32 %v1493_v34, %v475_v44 }
  0x8c   :  { %v358_v51 = vadd.f32 %v1493_v34, %v357_v47  ;;  %v398_v52 = vadd.f32 %v1493_v34, %v397_v48 }
  0x8d   :  { %v614_v57 = vmul.f32 0.1, %v436_v49  ;;  %v630_v58 = vmul.f32 0.1, %v476_v50  ;;  %vm550_vm7 = vcmp.gt.f32.partialorder %v436_v49, 0.0  ;;  %vm566_vm8 = vcmp.gt.f32.partialorder %v476_v50, 0.0 }
  0x8e   :  { %vm519_vm5 = vcmp.gt.f32.partialorder %v358_v51, 0.0  ;;  %v583_v53 = vmul.f32 0.1, %v358_v51  ;;  %vm535_vm6 = vcmp.gt.f32.partialorder %v398_v52, 0.0  ;;  %v599_v54 = vmul.f32 0.1, %v398_v52 }
  0x8f   :  { %v678_v7 = vsel %vm550_vm7, %v436_v49, %v614_v57  ;;  %v694_v8 = vsel %vm566_vm8, %v476_v50, %v630_v58 }
  0x90   :  { %v647_v59 = vsel %vm519_vm5, %v358_v51, %v583_v53  ;;  %v663_v60 = vsel %vm535_vm6, %v398_v52, %v599_v54  ;;  %v742_v14 = vsel %vm517_vm4, %v678_v7, %v436_v49  ;;  %v758_v15 = vsel %vm517_vm4, %v694_v8, %v476_v50 }
  0x91   :  { %v711_v61 = vsel %vm517_vm4, %v647_v59, %v358_v51  ;;  %v727_v62 = vsel %vm517_vm4, %v663_v60, %v398_v52 }
  0x92   :  { %v1115_v63 = vpack.c.bf16 %v711_v61, %v710_v55  ;;  %v1155_v0 = vpack.c.bf16 %v727_v62, %v726_v56  ;;  %v437_v1 = vpop.f32.mrf.mxu2  ;;  %v477_v2 = vpop.f32.mrf.mxu3 }
  0x93   :  { %v438_v3 = vadd.f32 %v1493_v34, %v437_v1  ;;  %v478_v4 = vadd.f32 %v1493_v34, %v477_v2  ;;  %v360_v5 = vpop.f32.mrf.mxu0  ;;  %v400_v6 = vpop.f32.mrf.mxu1 }
  0x94   :  { %1116 = vst [vmem:[#allocation2] sm:$0xff] %v1115_v63   ;;  %v361_v9 = vadd.f32 %v1493_v34, %v360_v5  ;;  %v401_v11 = vadd.f32 %v1493_v34, %v400_v6 }
  0x95   :  { %1279 = vst [vmem:[#allocation2 + $0x40] sm:$0xff] %v1155_v0   ;;  %vm551_vm9 = vcmp.gt.f32.partialorder %v438_v3, 0.0  ;;  %v615_v10 = vmul.f32 0.1, %v438_v3  ;;  %vm567_vm10 = vcmp.gt.f32.partialorder %v478_v4, 0.0 }
  0x96   :  { %v631_v12 = vmul.f32 0.1, %v478_v4  ;;  %v584_v20 = vmul.f32 0.1, %v361_v9  ;;  %v600_v21 = vmul.f32 0.1, %v401_v11 }
  0x97   :  { %v679_v13 = vsel %vm551_vm9, %v438_v3, %v615_v10  ;;  %vm520_vm11 = vcmp.gt.f32.partialorder %v361_v9, 0.0  ;;  %vm536_vm12 = vcmp.gt.f32.partialorder %v401_v11, 0.0 }
  0x98   :  { %v743_v16 = vsel %vm517_vm4, %v679_v13, %v438_v3  ;;  %v695_v17 = vsel %vm567_vm10, %v478_v4, %v631_v12  ;;  %v648_v30 = vsel %vm520_vm11, %v361_v9, %v584_v20  ;;  %v664_v31 = vsel %vm536_vm12, %v401_v11, %v600_v21 }
  0x99   :  { %v1195_v18 = vpack.c.bf16 %v743_v16, %v742_v14  ;;  %v759_v19 = vsel %vm517_vm4, %v695_v17, %v478_v4  ;;  %v712_v36 = vsel %vm517_vm4, %v648_v30, %v361_v9  ;;  %v728_v41 = vsel %vm517_vm4, %v664_v31, %v401_v11 }
  0x9a   :  { %v1235_v22 = vpack.c.bf16 %v759_v19, %v758_v15  ;;  %v440_v23 = vpop.f32.mrf.mxu2  ;;  %v480_v24 = vpop.f32.mrf.mxu3 }
  0x9b   :  { %1287 = vst [vmem:[#allocation2 + $0x80] sm:$0xff] %v1195_v18   ;;  %v362_v25 = vpop.f32.mrf.mxu0  ;;  %v402_v26 = vpop.f32.mrf.mxu1  ;;  %v441_v27 = vadd.f32 %v1493_v34, %v440_v23  ;;  %v481_v32 = vadd.f32 %v1493_v34, %v480_v24 }
  0x9c   :  { %1295 = vst [vmem:[#allocation2 + $0xc0] sm:$0xff] %v1235_v22   ;;  %v363_v28 = vadd.f32 %v1493_v34, %v362_v25  ;;  %v403_v29 = vadd.f32 %v1493_v34, %v402_v26 }
  0x9d   :  { %v616_v37 = vmul.f32 0.1, %v441_v27  ;;  %vm552_vm15 = vcmp.gt.f32.partialorder %v441_v27, 0.0  ;;  %v632_v44 = vmul.f32 0.1, %v481_v32  ;;  %vm568_vm0 = vcmp.gt.f32.partialorder %v481_v32, 0.0 }
  0x9e   :  { %vm521_vm13 = vcmp.gt.f32.partialorder %v363_v28, 0.0  ;;  %v585_v33 = vmul.f32 0.1, %v363_v28  ;;  %vm537_vm14 = vcmp.gt.f32.partialorder %v403_v29, 0.0  ;;  %v601_v35 = vmul.f32 0.1, %v403_v29 }
  0x9f   :  { %v680_v53 = vsel %vm552_vm15, %v441_v27, %v616_v37  ;;  %v696_v57 = vsel %vm568_vm0, %v481_v32, %v632_v44 }
  0xa0   :  { %v649_v38 = vsel %vm521_vm13, %v363_v28, %v585_v33  ;;  %v665_v39 = vsel %vm537_vm14, %v403_v29, %v601_v35  ;;  %v744_v59 = vsel %vm517_vm4, %v680_v53, %v441_v27  ;;  %v760_v1 = vsel %vm517_vm4, %v696_v57, %v481_v32 }
  0xa1   :  { %v713_v42 = vsel %vm517_vm4, %v649_v38, %v363_v28  ;;  %v729_v43 = vsel %vm517_vm4, %v665_v39, %v403_v29 }
  0xa2   :  { %v1120_v45 = vpack.c.bf16 %v713_v42, %v712_v36  ;;  %v1160_v46 = vpack.c.bf16 %v729_v43, %v728_v41  ;;  %v442_v47 = vpop.f32.mrf.mxu2  ;;  %v482_v48 = vpop.f32.mrf.mxu3 }
  0xa3   :  { %v443_v49 = vadd.f32 %v1493_v34, %v442_v47  ;;  %v483_v50 = vadd.f32 %v1493_v34, %v482_v48  ;;  %v365_v51 = vpop.f32.mrf.mxu0  ;;  %v405_v52 = vpop.f32.mrf.mxu1 }
  0xa4   :  { %1272 = vst [vmem:[#allocation2 + $0x8] sm:$0xff] %v1120_v45   ;;  %v366_v54 = vadd.f32 %v1493_v34, %v365_v51  ;;  %v406_v55 = vadd.f32 %v1493_v34, %v405_v52 }
  0xa5   :  { %1280 = vst [vmem:[#allocation2 + $0x48] sm:$0xff] %v1160_v46   ;;  %vm553_vm1 = vcmp.gt.f32.partialorder %v443_v49, 0.0  ;;  %v617_v56 = vmul.f32 0.1, %v443_v49  ;;  %vm569_vm2 = vcmp.gt.f32.partialorder %v483_v50, 0.0 }
  0xa6   :  { %v633_v58 = vmul.f32 0.1, %v483_v50  ;;  %v586_v61 = vmul.f32 0.1, %v366_v54  ;;  %v602_v62 = vmul.f32 0.1, %v406_v55 }
  0xa7   :  { %v681_v60 = vsel %vm553_vm1, %v443_v49, %v617_v56  ;;  %vm522_vm3 = vcmp.gt.f32.partialorder %v366_v54, 0.0  ;;  %vm538_vm5 = vcmp.gt.f32.partialorder %v406_v55, 0.0 }
  0xa8   :  { %v745_v63 = vsel %vm517_vm4, %v681_v60, %v443_v49  ;;  %v697_v0 = vsel %vm569_vm2, %v483_v50, %v633_v58  ;;  %v650_v7 = vsel %vm522_vm3, %v366_v54, %v586_v61  ;;  %v666_v8 = vsel %vm538_vm5, %v406_v55, %v602_v62 }
  0xa9   :  { %v1200_v2 = vpack.c.bf16 %v745_v63, %v744_v59  ;;  %v761_v3 = vsel %vm517_vm4, %v697_v0, %v483_v50  ;;  %v714_v17 = vsel %vm517_vm4, %v650_v7, %v366_v54  ;;  %v730_v18 = vsel %vm517_vm4, %v666_v8, %v406_v55 }
  0xaa   :  { %v1240_v4 = vpack.c.bf16 %v761_v3, %v760_v1  ;;  %v445_v5 = vpop.f32.mrf.mxu2  ;;  %v485_v6 = vpop.f32.mrf.mxu3 }
  0xab   :  { %1288 = vst [vmem:[#allocation2 + $0x88] sm:$0xff] %v1200_v2   ;;  %v367_v9 = vpop.f32.mrf.mxu0  ;;  %v407_v10 = vpop.f32.mrf.mxu1  ;;  %v446_v11 = vadd.f32 %v1493_v34, %v445_v5  ;;  %v486_v12 = vadd.f32 %v1493_v34, %v485_v6 }
  0xac   :  { %1296 = vst [vmem:[#allocation2 + $0xc8] sm:$0xff] %v1240_v4   ;;  %v368_v13 = vadd.f32 %v1493_v34, %v367_v9  ;;  %v408_v14 = vadd.f32 %v1493_v34, %v407_v10 }
  0xad   :  { %v618_v19 = vmul.f32 0.1, %v446_v11  ;;  %v634_v20 = vmul.f32 0.1, %v486_v12  ;;  %vm554_vm8 = vcmp.gt.f32.partialorder %v446_v11, 0.0  ;;  %vm570_vm9 = vcmp.gt.f32.partialorder %v486_v12, 0.0 }
  0xae   :  { %vm523_vm6 = vcmp.gt.f32.partialorder %v368_v13, 0.0  ;;  %v587_v15 = vmul.f32 0.1, %v368_v13  ;;  %vm539_vm7 = vcmp.gt.f32.partialorder %v408_v14, 0.0  ;;  %v603_v16 = vmul.f32 0.1, %v408_v14 }
  0xaf   :  { %v682_v33 = vsel %vm554_vm8, %v446_v11, %v618_v19  ;;  %v698_v35 = vsel %vm570_vm9, %v486_v12, %v634_v20 }
  0xb0   :  { %v651_v21 = vsel %vm523_vm6, %v368_v13, %v587_v15  ;;  %v667_v22 = vsel %vm539_vm7, %v408_v14, %v603_v16  ;;  %v746_v42 = vsel %vm517_vm4, %v682_v33, %v446_v11  ;;  %v762_v43 = vsel %vm517_vm4, %v698_v35, %v486_v12 }
  0xb1   :  { %v715_v23 = vsel %vm517_vm4, %v651_v21, %v368_v13  ;;  %v731_v24 = vsel %vm517_vm4, %v667_v22, %v408_v14 }
  0xb2   :  { %v1125_v25 = vpack.c.bf16 %v715_v23, %v714_v17  ;;  %v1165_v26 = vpack.c.bf16 %v731_v24, %v730_v18  ;;  %v447_v27 = vpop.f32.mrf.mxu2  ;;  %v487_v28 = vpop.f32.mrf.mxu3 }
  0xb3   :  { %v448_v29 = vadd.f32 %v1493_v34, %v447_v27  ;;  %v488_v30 = vadd.f32 %v1493_v34, %v487_v28  ;;  %v370_v31 = vpop.f32.mrf.mxu0  ;;  %v410_v32 = vpop.f32.mrf.mxu1 }
  0xb4   :  { %1273 = vst [vmem:[#allocation2 + $0x10] sm:$0xff] %v1125_v25   ;;  %v371_v36 = vadd.f32 %v1493_v34, %v370_v31  ;;  %v411_v38 = vadd.f32 %v1493_v34, %v410_v32 }
  0xb5   :  { %1281 = vst [vmem:[#allocation2 + $0x50] sm:$0xff] %v1165_v26   ;;  %vm555_vm10 = vcmp.gt.f32.partialorder %v448_v29, 0.0  ;;  %v619_v37 = vmul.f32 0.1, %v448_v29  ;;  %vm571_vm11 = vcmp.gt.f32.partialorder %v488_v30, 0.0 }
  0xb6   :  { %v635_v39 = vmul.f32 0.1, %v488_v30  ;;  %v588_v48 = vmul.f32 0.1, %v371_v36  ;;  %v604_v49 = vmul.f32 0.1, %v411_v38 }
  0xb7   :  { %v683_v41 = vsel %vm555_vm10, %v448_v29, %v619_v37  ;;  %vm524_vm12 = vcmp.gt.f32.partialorder %v371_v36, 0.0  ;;  %vm540_vm13 = vcmp.gt.f32.partialorder %v411_v38, 0.0 }
  0xb8   :  { %v747_v44 = vsel %vm517_vm4, %v683_v41, %v448_v29  ;;  %v699_v45 = vsel %vm571_vm11, %v488_v30, %v635_v39  ;;  %v652_v58 = vsel %vm524_vm12, %v371_v36, %v588_v48  ;;  %v668_v59 = vsel %vm540_vm13, %v411_v38, %v604_v49 }
  0xb9   :  { %v1205_v46 = vpack.c.bf16 %v747_v44, %v746_v42  ;;  %v763_v47 = vsel %vm517_vm4, %v699_v45, %v488_v30  ;;  %v716_v63 = vsel %vm517_vm4, %v652_v58, %v371_v36  ;;  %v732_v3 = vsel %vm517_vm4, %v668_v59, %v411_v38 }
  0xba   :  { %v1245_v50 = vpack.c.bf16 %v763_v47, %v762_v43  ;;  %v450_v51 = vpop.f32.mrf.mxu2  ;;  %v490_v52 = vpop.f32.mrf.mxu3 }
  0xbb   :  { %1289 = vst [vmem:[#allocation2 + $0x90] sm:$0xff] %v1205_v46   ;;  %v372_v53 = vpop.f32.mrf.mxu0  ;;  %v412_v54 = vpop.f32.mrf.mxu1  ;;  %v451_v55 = vadd.f32 %v1493_v34, %v450_v51  ;;  %v491_v60 = vadd.f32 %v1493_v34, %v490_v52 }
  0xbc   :  { %1297 = vst [vmem:[#allocation2 + $0xd0] sm:$0xff] %v1245_v50   ;;  %v373_v56 = vadd.f32 %v1493_v34, %v372_v53  ;;  %v413_v57 = vadd.f32 %v1493_v34, %v412_v54 }
  0xbd   :  { %v620_v0 = vmul.f32 0.1, %v451_v55  ;;  %vm556_vm0 = vcmp.gt.f32.partialorder %v451_v55, 0.0  ;;  %v636_v6 = vmul.f32 0.1, %v491_v60  ;;  %vm572_vm1 = vcmp.gt.f32.partialorder %v491_v60, 0.0 }
  0xbe   :  { %vm525_vm14 = vcmp.gt.f32.partialorder %v373_v56, 0.0  ;;  %v589_v61 = vmul.f32 0.1, %v373_v56  ;;  %vm541_vm15 = vcmp.gt.f32.partialorder %v413_v57, 0.0  ;;  %v605_v62 = vmul.f32 0.1, %v413_v57 }
  0xbf   :  { %v684_v15 = vsel %vm556_vm0, %v451_v55, %v620_v0  ;;  %v700_v19 = vsel %vm572_vm1, %v491_v60, %v636_v6 }
  0xc0   :  { %v653_v1 = vsel %vm525_vm14, %v373_v56, %v589_v61  ;;  %v669_v2 = vsel %vm541_vm15, %v413_v57, %v605_v62  ;;  %v748_v21 = vsel %vm517_vm4, %v684_v15, %v451_v55  ;;  %v764_v27 = vsel %vm517_vm4, %v700_v19, %v491_v60 }
  0xc1   :  { %v717_v4 = vsel %vm517_vm4, %v653_v1, %v373_v56  ;;  %v733_v5 = vsel %vm517_vm4, %v669_v2, %v413_v57 }
  0xc2   :  { %v1130_v7 = vpack.c.bf16 %v717_v4, %v716_v63  ;;  %v1170_v8 = vpack.c.bf16 %v733_v5, %v732_v3  ;;  %v452_v9 = vpop.f32.mrf.mxu2  ;;  %v492_v10 = vpop.f32.mrf.mxu3 }
  0xc3   :  { %v453_v11 = vadd.f32 %v1493_v34, %v452_v9  ;;  %v493_v12 = vadd.f32 %v1493_v34, %v492_v10  ;;  %v375_v13 = vpop.f32.mrf.mxu0  ;;  %v415_v14 = vpop.f32.mrf.mxu1 }
  0xc4   :  { %1274 = vst [vmem:[#allocation2 + $0x18] sm:$0xff] %v1130_v7   ;;  %v376_v16 = vadd.f32 %v1493_v34, %v375_v13  ;;  %v416_v17 = vadd.f32 %v1493_v34, %v415_v14 }
  0xc5   :  { %1282 = vst [vmem:[#allocation2 + $0x58] sm:$0xff] %v1170_v8   ;;  %vm557_vm2 = vcmp.gt.f32.partialorder %v453_v11, 0.0  ;;  %v621_v18 = vmul.f32 0.1, %v453_v11  ;;  %vm573_vm3 = vcmp.gt.f32.partialorder %v493_v12, 0.0 }
  0xc6   :  { %v637_v20 = vmul.f32 0.1, %v493_v12  ;;  %v590_v23 = vmul.f32 0.1, %v376_v16  ;;  %v606_v24 = vmul.f32 0.1, %v416_v17 }
  0xc7   :  { %v685_v22 = vsel %vm557_vm2, %v453_v11, %v621_v18  ;;  %vm526_vm5 = vcmp.gt.f32.partialorder %v376_v16, 0.0  ;;  %vm542_vm6 = vcmp.gt.f32.partialorder %v416_v17, 0.0 }
  0xc8   :  { %v749_v25 = vsel %vm517_vm4, %v685_v22, %v453_v11  ;;  %v701_v26 = vsel %vm573_vm3, %v493_v12, %v637_v20  ;;  %v654_v33 = vsel %vm526_vm5, %v376_v16, %v590_v23  ;;  %v670_v35 = vsel %vm542_vm6, %v416_v17, %v606_v24 }
  0xc9   :  { %v1210_v28 = vpack.c.bf16 %v749_v25, %v748_v21  ;;  %v765_v29 = vsel %vm517_vm4, %v701_v26, %v493_v12  ;;  %v718_v45 = vsel %vm517_vm4, %v654_v33, %v376_v16  ;;  %v734_v46 = vsel %vm517_vm4, %v670_v35, %v416_v17 }
  0xca   :  { %v1250_v30 = vpack.c.bf16 %v765_v29, %v764_v27  ;;  %v455_v31 = vpop.f32.mrf.mxu2  ;;  %v495_v32 = vpop.f32.mrf.mxu3 }
  0xcb   :  { %1290 = vst [vmem:[#allocation2 + $0x98] sm:$0xff] %v1210_v28   ;;  %v377_v36 = vpop.f32.mrf.mxu0  ;;  %v417_v37 = vpop.f32.mrf.mxu1  ;;  %v456_v38 = vadd.f32 %v1493_v34, %v455_v31  ;;  %v496_v39 = vadd.f32 %v1493_v34, %v495_v32 }
  0xcc   :  { %1298 = vst [vmem:[#allocation2 + $0xd8] sm:$0xff] %v1250_v30   ;;  %v378_v41 = vadd.f32 %v1493_v34, %v377_v36  ;;  %v418_v42 = vadd.f32 %v1493_v34, %v417_v37 }
  0xcd   :  { %v622_v47 = vmul.f32 0.1, %v456_v38  ;;  %v638_v48 = vmul.f32 0.1, %v496_v39  ;;  %vm558_vm9 = vcmp.gt.f32.partialorder %v456_v38, 0.0  ;;  %vm574_vm10 = vcmp.gt.f32.partialorder %v496_v39, 0.0 }
  0xce   :  { %vm527_vm7 = vcmp.gt.f32.partialorder %v378_v41, 0.0  ;;  %v591_v43 = vmul.f32 0.1, %v378_v41  ;;  %vm543_vm8 = vcmp.gt.f32.partialorder %v418_v42, 0.0  ;;  %v607_v44 = vmul.f32 0.1, %v418_v42 }
  0xcf   :  { %v686_v61 = vsel %vm558_vm9, %v456_v38, %v622_v47  ;;  %v702_v62 = vsel %vm574_vm10, %v496_v39, %v638_v48 }
  0xd0   :  { %v655_v49 = vsel %vm527_vm7, %v378_v41, %v591_v43  ;;  %v671_v50 = vsel %vm543_vm8, %v418_v42, %v607_v44  ;;  %v750_v4 = vsel %vm517_vm4, %v686_v61, %v456_v38  ;;  %v766_v5 = vsel %vm517_vm4, %v702_v62, %v496_v39 }
  0xd1   :  { %v719_v51 = vsel %vm517_vm4, %v655_v49, %v378_v41  ;;  %v735_v52 = vsel %vm517_vm4, %v671_v50, %v418_v42 }
  0xd2   :  { %v1135_v53 = vpack.c.bf16 %v719_v51, %v718_v45  ;;  %v1175_v54 = vpack.c.bf16 %v735_v52, %v734_v46  ;;  %v457_v55 = vpop.f32.mrf.mxu2  ;;  %v497_v56 = vpop.f32.mrf.mxu3 }
  0xd3   :  { %v458_v57 = vadd.f32 %v1493_v34, %v457_v55  ;;  %v498_v58 = vadd.f32 %v1493_v34, %v497_v56  ;;  %v380_v59 = vpop.f32.mrf.mxu0  ;;  %v420_v60 = vpop.f32.mrf.mxu1 }
  0xd4   :  { %1275 = vst [vmem:[#allocation2 + $0x20] sm:$0xff] %v1135_v53   ;;  %v381_v63 = vadd.f32 %v1493_v34, %v380_v59  ;;  %v421_v1 = vadd.f32 %v1493_v34, %v420_v60 }
  0xd5   :  { %1283 = vst [vmem:[#allocation2 + $0x60] sm:$0xff] %v1175_v54   ;;  %vm559_vm11 = vcmp.gt.f32.partialorder %v458_v57, 0.0  ;;  %v623_v0 = vmul.f32 0.1, %v458_v57  ;;  %vm575_vm12 = vcmp.gt.f32.partialorder %v498_v58, 0.0 }
  0xd6   :  { %v639_v2 = vmul.f32 0.1, %v498_v58  ;;  %v592_v10 = vmul.f32 0.1, %v381_v63  ;;  %v608_v11 = vmul.f32 0.1, %v421_v1 }
  0xd7   :  { %v687_v3 = vsel %vm559_vm11, %v458_v57, %v623_v0  ;;  %vm528_vm13 = vcmp.gt.f32.partialorder %v381_v63, 0.0  ;;  %vm544_vm14 = vcmp.gt.f32.partialorder %v421_v1, 0.0 }
  0xd8   :  { %v751_v6 = vsel %vm517_vm4, %v687_v3, %v458_v57  ;;  %v703_v7 = vsel %vm575_vm12, %v498_v58, %v639_v2  ;;  %v656_v20 = vsel %vm528_vm13, %v381_v63, %v592_v10  ;;  %v672_v21 = vsel %vm544_vm14, %v421_v1, %v608_v11 }
  0xd9   :  { %v1215_v8 = vpack.c.bf16 %v751_v6, %v750_v4  ;;  %v767_v9 = vsel %vm517_vm4, %v703_v7, %v498_v58  ;;  %v720_v25 = vsel %vm517_vm4, %v656_v20, %v381_v63  ;;  %v736_v29 = vsel %vm517_vm4, %v672_v21, %v421_v1 }
  0xda   :  { %v1255_v12 = vpack.c.bf16 %v767_v9, %v766_v5  ;;  %v460_v13 = vpop.f32.mrf.mxu2  ;;  %v500_v14 = vpop.f32.mrf.mxu3 }
  0xdb   :  { %1291 = vst [vmem:[#allocation2 + $0xa0] sm:$0xff] %v1215_v8   ;;  %v382_v15 = vpop.f32.mrf.mxu0  ;;  %v422_v16 = vpop.f32.mrf.mxu1  ;;  %v461_v17 = vadd.f32 %v1493_v34, %v460_v13  ;;  %v501_v22 = vadd.f32 %v1493_v34, %v500_v14 }
  0xdc   :  { %1299 = vst [vmem:[#allocation2 + $0xe0] sm:$0xff] %v1255_v12   ;;  %v383_v18 = vadd.f32 %v1493_v34, %v382_v15  ;;  %v423_v19 = vadd.f32 %v1493_v34, %v422_v16 }
  0xdd   :  { %v624_v26 = vmul.f32 0.1, %v461_v17  ;;  %vm560_vm1 = vcmp.gt.f32.partialorder %v461_v17, 0.0  ;;  %v640_v32 = vmul.f32 0.1, %v501_v22  ;;  %vm576_vm2 = vcmp.gt.f32.partialorder %v501_v22, 0.0 }
  0xde   :  { %vm529_vm15 = vcmp.gt.f32.partialorder %v383_v18, 0.0  ;;  %v593_v23 = vmul.f32 0.1, %v383_v18  ;;  %vm545_vm0 = vcmp.gt.f32.partialorder %v423_v19, 0.0  ;;  %v609_v24 = vmul.f32 0.1, %v423_v19 }
  0xdf   :  { %v688_v43 = vsel %vm560_vm1, %v461_v17, %v624_v26  ;;  %v704_v47 = vsel %vm576_vm2, %v501_v22, %v640_v32 }
  0xe0   :  { %v657_v27 = vsel %vm529_vm15, %v383_v18, %v593_v23  ;;  %v673_v28 = vsel %vm545_vm0, %v423_v19, %v609_v24  ;;  %v752_v49 = vsel %vm517_vm4, %v688_v43, %v461_v17  ;;  %v768_v55 = vsel %vm517_vm4, %v704_v47, %v501_v22 }
  0xe1   :  { %v721_v30 = vsel %vm517_vm4, %v657_v27, %v383_v18  ;;  %v737_v31 = vsel %vm517_vm4, %v673_v28, %v423_v19 }
  0xe2   :  { %v1140_v33 = vpack.c.bf16 %v721_v30, %v720_v25  ;;  %v1180_v35 = vpack.c.bf16 %v737_v31, %v736_v29  ;;  %v462_v36 = vpop.f32.mrf.mxu2  ;;  %v502_v37 = vpop.f32.mrf.mxu3 }
  0xe3   :  { %v463_v38 = vadd.f32 %v1493_v34, %v462_v36  ;;  %v503_v39 = vadd.f32 %v1493_v34, %v502_v37  ;;  %v385_v41 = vpop.f32.mrf.mxu0  ;;  %v425_v42 = vpop.f32.mrf.mxu1 }
  0xe4   :  { %1276 = vst [vmem:[#allocation2 + $0x28] sm:$0xff] %v1140_v33   ;;  %v386_v44 = vadd.f32 %v1493_v34, %v385_v41  ;;  %v426_v45 = vadd.f32 %v1493_v34, %v425_v42 }
  0xe5   :  { %1284 = vst [vmem:[#allocation2 + $0x68] sm:$0xff] %v1180_v35   ;;  %vm561_vm3 = vcmp.gt.f32.partialorder %v463_v38, 0.0  ;;  %v625_v46 = vmul.f32 0.1, %v463_v38  ;;  %vm577_vm5 = vcmp.gt.f32.partialorder %v503_v39, 0.0 }
  0xe6   :  { %v641_v48 = vmul.f32 0.1, %v503_v39  ;;  %v594_v51 = vmul.f32 0.1, %v386_v44  ;;  %v610_v52 = vmul.f32 0.1, %v426_v45 }
  0xe7   :  { %v689_v50 = vsel %vm561_vm3, %v463_v38, %v625_v46  ;;  %vm530_vm6 = vcmp.gt.f32.partialorder %v386_v44, 0.0  ;;  %vm546_vm7 = vcmp.gt.f32.partialorder %v426_v45, 0.0 }
  0xe8   :  { %v753_v53 = vsel %vm517_vm4, %v689_v50, %v463_v38  ;;  %v705_v54 = vsel %vm577_vm5, %v503_v39, %v641_v48  ;;  %v658_v61 = vsel %vm530_vm6, %v386_v44, %v594_v51  ;;  %v674_v62 = vsel %vm546_vm7, %v426_v45, %v610_v52 }
  0xe9   :  { %v1220_v56 = vpack.c.bf16 %v753_v53, %v752_v49  ;;  %v769_v57 = vsel %vm517_vm4, %v705_v54, %v503_v39  ;;  %v722_v7 = vsel %vm517_vm4, %v658_v61, %v386_v44  ;;  %v738_v8 = vsel %vm517_vm4, %v674_v62, %v426_v45 }
  0xea   :  { %v1260_v58 = vpack.c.bf16 %v769_v57, %v768_v55  ;;  %v465_v59 = vpop.f32.mrf.mxu2  ;;  %v505_v60 = vpop.f32.mrf.mxu3 }
  0xeb   :  { %1292 = vst [vmem:[#allocation2 + $0xa8] sm:$0xff] %v1220_v56   ;;  %v387_v63 = vpop.f32.mrf.mxu0  ;;  %v427_v0 = vpop.f32.mrf.mxu1  ;;  %v466_v1 = vadd.f32 %v1493_v34, %v465_v59  ;;  %v506_v2 = vadd.f32 %v1493_v34, %v505_v60 }
  0xec   :  { %1300 = vst [vmem:[#allocation2 + $0xe8] sm:$0xff] %v1260_v58   ;;  %v388_v3 = vadd.f32 %v1493_v34, %v387_v63  ;;  %v428_v4 = vadd.f32 %v1493_v34, %v427_v0 }
  0xed   :  { %v626_v9 = vmul.f32 0.1, %v466_v1  ;;  %v642_v10 = vmul.f32 0.1, %v506_v2  ;;  %vm562_vm10 = vcmp.gt.f32.partialorder %v466_v1, 0.0  ;;  %vm578_vm11 = vcmp.gt.f32.partialorder %v506_v2, 0.0 }
  0xee   :  { %vm531_vm8 = vcmp.gt.f32.partialorder %v388_v3, 0.0  ;;  %v595_v5 = vmul.f32 0.1, %v388_v3  ;;  %vm547_vm9 = vcmp.gt.f32.partialorder %v428_v4, 0.0  ;;  %v611_v6 = vmul.f32 0.1, %v428_v4 }
  0xef   :  { %v690_v23 = vsel %vm562_vm10, %v466_v1, %v626_v9  ;;  %v706_v24 = vsel %vm578_vm11, %v506_v2, %v642_v10 }
  0xf0   :  { %v659_v11 = vsel %vm531_vm8, %v388_v3, %v595_v5  ;;  %v675_v12 = vsel %vm547_vm9, %v428_v4, %v611_v6  ;;  %v754_v30 = vsel %vm517_vm4, %v690_v23, %v466_v1  ;;  %v770_v31 = vsel %vm517_vm4, %v706_v24, %v506_v2 }
  0xf1   :  { %v723_v13 = vsel %vm517_vm4, %v659_v11, %v388_v3  ;;  %v739_v14 = vsel %vm517_vm4, %v675_v12, %v428_v4 }
  0xf2   :  { %v1145_v15 = vpack.c.bf16 %v723_v13, %v722_v7  ;;  %v1185_v16 = vpack.c.bf16 %v739_v14, %v738_v8  ;;  %v467_v17 = vpop.f32.mrf.mxu2  ;;  %v507_v18 = vpop.f32.mrf.mxu3 }
  0xf3   :  { %v468_v19 = vadd.f32 %v1493_v34, %v467_v17  ;;  %v508_v20 = vadd.f32 %v1493_v34, %v507_v18  ;;  %v390_v21 = vpop.f32.mrf.mxu0  ;;  %v430_v22 = vpop.f32.mrf.mxu1 }
  0xf4   :  { %1277 = vst [vmem:[#allocation2 + $0x30] sm:$0xff] %v1145_v15   ;;  %v391_v25 = vadd.f32 %v1493_v34, %v390_v21  ;;  %v431_v27 = vadd.f32 %v1493_v34, %v430_v22 }
  0xf5   :  { %1285 = vst [vmem:[#allocation2 + $0x70] sm:$0xff] %v1185_v16   ;;  %vm563_vm12 = vcmp.gt.f32.partialorder %v468_v19, 0.0  ;;  %v627_v26 = vmul.f32 0.1, %v468_v19  ;;  %vm579_vm13 = vcmp.gt.f32.partialorder %v508_v20, 0.0 }
  0xf6   :  { %v643_v28 = vmul.f32 0.1, %v508_v20  ;;  %v596_v37 = vmul.f32 0.1, %v391_v25  ;;  %v612_v38 = vmul.f32 0.1, %v431_v27 }
  0xf7   :  { %v691_v29 = vsel %vm563_vm12, %v468_v19, %v627_v26  ;;  %vm532_vm14 = vcmp.gt.f32.partialorder %v391_v25, 0.0  ;;  %vm548_vm15 = vcmp.gt.f32.partialorder %v431_v27, 0.0 }
  0xf8   :  { %v755_v32 = vsel %vm517_vm4, %v691_v29, %v468_v19  ;;  %v707_v33 = vsel %vm579_vm13, %v508_v20, %v643_v28  ;;  %v660_v47 = vsel %vm532_vm14, %v391_v25, %v596_v37  ;;  %v676_v48 = vsel %vm548_vm15, %v431_v27, %v612_v38 }
  0xf9   :  { %v1225_v35 = vpack.c.bf16 %v755_v32, %v754_v30  ;;  %v771_v36 = vsel %vm517_vm4, %v707_v33, %v508_v20  ;;  %v724_v53 = vsel %vm517_vm4, %v660_v47, %v391_v25  ;;  %v740_v56 = vsel %vm517_vm4, %v676_v48, %v431_v27 }
  0xfa   :  { %v1265_v39 = vpack.c.bf16 %v771_v36, %v770_v31  ;;  %v470_v41 = vpop.f32.mrf.mxu2  ;;  %v510_v42 = vpop.f32.mrf.mxu3 }
  0xfb   :  { %1293 = vst [vmem:[#allocation2 + $0xb0] sm:$0xff] %v1225_v35   ;;  %v392_v43 = vpop.f32.mrf.mxu0  ;;  %v432_v44 = vpop.f32.mrf.mxu1  ;;  %v471_v49 = vadd.f32 %v1493_v34, %v470_v41  ;;  %v511_v50 = vadd.f32 %v1493_v34, %v510_v42 }
  0xfc   :  { %1301 = vst [vmem:[#allocation2 + $0xf0] sm:$0xff] %v1265_v39   ;;  %v393_v45 = vadd.f32 %v1493_v34, %v392_v43  ;;  %v433_v46 = vadd.f32 %v1493_v34, %v432_v44 }
  0xfd   :  { %v628_v57 = vmul.f32 0.1, %v471_v49  ;;  %vm564_vm2 = vcmp.gt.f32.partialorder %v471_v49, 0.0  ;;  %v644_v60 = vmul.f32 0.1, %v511_v50  ;;  %vm580_vm3 = vcmp.gt.f32.partialorder %v511_v50, 0.0 }
  0xfe   :  { %vm533_vm0 = vcmp.gt.f32.partialorder %v393_v45, 0.0  ;;  %v597_v51 = vmul.f32 0.1, %v393_v45  ;;  %vm549_vm1 = vcmp.gt.f32.partialorder %v433_v46, 0.0  ;;  %v613_v52 = vmul.f32 0.1, %v433_v46 }
  0xff   :  { %v692_v3 = vsel %vm564_vm2, %v471_v49, %v628_v57  ;;  %v708_v5 = vsel %vm580_vm3, %v511_v50, %v644_v60 }
 0x100   :  { %v661_v54 = vsel %vm533_vm0, %v393_v45, %v597_v51  ;;  %v677_v55 = vsel %vm549_vm1, %v433_v46, %v613_v52  ;;  %v756_v8 = vsel %vm517_vm4, %v692_v3, %v471_v49  ;;  %v772_v10 = vsel %vm517_vm4, %v708_v5, %v511_v50 }
 0x101   :  { %v725_v58 = vsel %vm517_vm4, %v661_v54, %v393_v45  ;;  %v741_v59 = vsel %vm517_vm4, %v677_v55, %v433_v46 }
 0x102   :  { %v1150_v61 = vpack.c.bf16 %v725_v58, %v724_v53  ;;  %v1190_v62 = vpack.c.bf16 %v741_v59, %v740_v56  ;;  %v472_v63 = vpop.f32.mrf.mxu2  ;;  %v512_v0 = vpop.f32.mrf.mxu3 }
 0x103   :  { %v473_v1 = vadd.f32 %v1493_v34, %v472_v63  ;;  %v513_v2 = vadd.f32 %v1493_v34, %v512_v0 }
 0x104   :  { %1278 = vst [vmem:[#allocation2 + $0x38] sm:$0xff] %v1150_v61  }
 0x105   :  { %1286 = vst [vmem:[#allocation2 + $0x78] sm:$0xff] %v1190_v62   ;;  %vm565_vm5 = vcmp.gt.f32.partialorder %v473_v1, 0.0  ;;  %v629_v4 = vmul.f32 0.1, %v473_v1  ;;  %vm581_vm6 = vcmp.gt.f32.partialorder %v513_v2, 0.0 }
 0x106   :  { %v645_v6 = vmul.f32 0.1, %v513_v2 }
 0x107   :  { %v693_v7 = vsel %vm565_vm5, %v473_v1, %v629_v4 }
 0x108   :  { %v757_v34 = vsel %vm517_vm4, %v693_v7, %v473_v1  ;;  %v709_v9 = vsel %vm581_vm6, %v513_v2, %v645_v6 }
 0x109   :  { %v1230_v11 = vpack.c.bf16 %v757_v34, %v756_v8  ;;  %v773_v12 = vsel %vm517_vm4, %v709_v9, %v513_v2 }
 0x10a   :  { %v1270_v13 = vpack.c.bf16 %v773_v12, %v772_v10 }
 0x10b   :  { %1294 = vst [vmem:[#allocation2 + $0xb8] sm:$0xff] %v1230_v11  }
 0x10c   :  { %1302 = vst [vmem:[#allocation2 + $0xf8] sm:$0xff] %v1270_v13  }
 0x10d   :  { %914 = dma.vmem_to_hbm [thread:$0]  %s907_s2, 4096, %s909_s25, [#allocation3], %s1337_s3, %s1337_s3, %s1338_s26  }
 0x10e   :  { %1334 = dma.done.wait [#allocation3], 4096  }
 0x10f   :  { %1335 = vsyncadd [#allocation3], 4294963200 }
 0x110   :  { %919 = vsyncpa [#allocation3], 1 }

</bundles_post_ra>
